<compile_context>
chip_gen: v5e
topology: v5e:2x2
jax: 0.10.0
libtpu: 0.0.40
codegen_flags: <defaults>
</compile_context>

<pallas_src>
import functools

import jax
import jax.numpy as jnp
from jax.experimental import pallas as pl
from jax.experimental.pallas import tpu as pltpu


# ----------------------------------------------------------------------------
# Kernel: one (batch, row-tile) per grid step, full (C, S_tile) lane-dense block.
# ----------------------------------------------------------------------------
def _dsconv_kernel(w_dw_ref, b_dw_ref, w_pw_ref, b_pw_ref, x_ref, o_ref, *, W, K, T_S):
    S = x_ref.shape[-1]          # lane-padded tile length, multiple of 128
    r = K // 2

    x = x_ref[0, 0].astype(jnp.float32)                    # (C_in, S), cast in VMEM

    # column index of every flattened spatial position; replaces the old float mask operand
    # (a handful of one-off VPU ops per grid step).
    col = jax.lax.broadcasted_iota(jnp.int32, (1, S), 1) % W

    acc = jnp.zeros(x.shape, jnp.float32)
    tap = 0
    # Depthwise KxK conv (stride 1, "same" zero padding), grouped by column offset:
    #   out[c, s] = sum_{dcol, dh} w[c, dh, dcol] * x[c, s + dh*W + dcol]
    # Vertical (dh) wraps land in the zero halo/padding rows -> masked only by column.
    for dcol in range(-r, r + 1):
        xc = pltpu.roll(x, (-dcol) % S, 1) if dcol != 0 else x      # XLU roll
        if dcol < 0:
            xc = jnp.where(col >= -dcol, xc, 0.0)                   # left-border mask
        elif dcol > 0:
            xc = jnp.where(col < W - dcol, xc, 0.0)                 # right-border mask
        for dh in range(-r, r + 1):
            shifted = pltpu.roll(xc, (-dh * W) % S, 1) if dh != 0 else xc
            acc = acc + shifted * w_dw_ref[tap]                     # (C_in,1) tap weight
            tap += 1

    # folded depthwise BN bias + ReLU6
    acc = jnp.clip(acc + b_dw_ref[...], 0.0, 6.0)                   # (C_in, S)

    # keep only this tile's own rows (drop halo rows + lane padding) for the pointwise op
    inner = acc[:, r * W: r * W + T_S]                              # (C_in, T_S)

    # pointwise 1x1 conv + folded BN: single MXU matmul (operands in w_pw's dtype,
    # f32 accumulate), lane-dense (C_out, T_S) output block.
    out = jnp.dot(w_pw_ref[...], inner.astype(w_pw_ref.dtype),
                  preferred_element_type=jnp.float32)
    out = out + b_pw_ref[...]
    o_ref[0] = out.astype(o_ref.dtype)


# ----------------------------------------------------------------------------
# Sizing helpers.
# ----------------------------------------------------------------------------
def _round_up(v, m):
    return -(-v // m) * m


def _physical_vmem_bytes():
    try:
        return int(pltpu.get_tpu_info().vmem_capacity_bytes)
    except Exception:
        return 64 * 1024 * 1024          # conservative fallback (v7x per-core figure)


def _choose_tile_rows(H, W, r, C_in, C_out, in_bytes, out_bytes, budget, max_rows=None):
    """Rows per spatial tile: must divide H; sub-frame tiles must keep the output block
    lane-aligned (T_H*W % 128 == 0). Falls back to a single full-frame tile."""
    def live_bytes(t):
        s_tp = _round_up((t + 2 * r) * W, 128)
        return (2 * C_in * s_tp * in_bytes + 2 * C_out * t * W * out_bytes
                + 5 * C_in * s_tp * 4 + 2 * C_out * t * W * 4)

    limit = max_rows if max_rows is not None else H
    cand = [d for d in range(1, H + 1)
            if H % d == 0 and d <= limit and live_bytes(d) <= budget
            and (d == H or (d * W) % 128 == 0)]
    return max(cand) if cand else H


def _vmem_limit_bytes(C_in, C_out, S_tp_pad, T_S, K, in_bytes, out_bytes, mxu_bytes, cap):
    # double-buffered pipeline blocks, padded to the (8,128) register tiling
    blocks = 2 * (_round_up(C_in, 8) * S_tp_pad * in_bytes
                  + _round_up(C_out, 8) * _round_up(T_S, 128) * out_bytes
                  + K * K * _round_up(C_in, 8) * 128 * 4
                  + _round_up(C_in, 8) * 128 * 4
                  + _round_up(C_out, 8) * _round_up(C_in, 128) * mxu_bytes
                  + _round_up(C_out, 8) * 128 * 4)
    # in-kernel f32 temporaries (x, xc, shifted, acc, inner) + matmul output
    temps = (5 * _round_up(C_in, 8) * S_tp_pad
             + 2 * _round_up(C_out, 8) * _round_up(T_S, 128)) * 4
    return int(min(cap, max(2 * (blocks + temps), 32 * 1024 * 1024)))


# ----------------------------------------------------------------------------
# Wrapper: BN folding, halo-tile construction, pallas_call.
# ----------------------------------------------------------------------------
def ds_conv(x, params, *, kernel_size=3, stride=1, eps=1e-5,
            mxu_dtype=jnp.bfloat16, max_rows_per_tile=None):
    assert stride == 1, "only stride=1 (module default) implemented"
    K = kernel_size
    assert K % 2 == 1
    r = K // 2
    N, C_in, H, W = x.shape
    C_out = params["pw_weight"].shape[0]
    f32 = jnp.float32

    # ---- fold BatchNorm (inference) into conv weights / biases ----
    s_dw = params["dw_gamma"].astype(f32) / jnp.sqrt(params["dw_var"].astype(f32) + eps)
    w_dw = params["dw_weight"].astype(f32) * s_dw[:, None, None]          # (C_in, K, K)
    b_dw = params["dw_beta"].astype(f32) - params["dw_mean"].astype(f32) * s_dw

    s_pw = params["pw_gamma"].astype(f32) / jnp.sqrt(params["pw_var"].astype(f32) + eps)
    w_pw = params["pw_weight"].astype(f32) * s_pw[:, None]                # (C_out, C_in)
    b_pw = params["pw_beta"].astype(f32) - params["pw_mean"].astype(f32) * s_pw

    # per-tap depthwise weights ordered to match the kernel loop (dcol-major, dh-minor)
    taps = [w_dw[:, dh + r, dcol + r]
            for dcol in range(-r, r + 1) for dh in range(-r, r + 1)]
    w_taps = jnp.stack(taps, axis=0)[:, :, None]                          # (K*K, C_in, 1)

    # ---- spatial row tiling (halo = r rows each side) ----
    in_bytes = jnp.dtype(x.dtype).itemsize
    out_bytes = in_bytes                       # output dtype follows input dtype
    mxu_bytes = jnp.dtype(mxu_dtype).itemsize
    cap = int(_physical_vmem_bytes() * 0.85)   # generation-aware, with headroom

    T_H = _choose_tile_rows(H, W, r, C_in, C_out, in_bytes, out_bytes,
                            budget=int(cap * 0.6), max_rows=max_rows_per_tile)
    nT = H // T_H
    T_S = T_H * W
    S_tp = (T_H + 2 * r) * W
    S_tp_pad = _round_up(S_tp, 128)            # lane-aligned rolls / loads

    x_pad = jnp.pad(x, ((0, 0), (0, 0), (r, r), (0, 0)))                  # zero halo rows
    if nT == 1:
        x_tiles = x_pad.reshape(N, 1, C_in, S_tp)
    else:
        x_tiles = jnp.stack(
            [x_pad[:, :, t * T_H: t * T_H + T_H + 2 * r, :] for t in range(nT)],
            axis=1).reshape(N, nT, C_in, S_tp)
    if S_tp_pad != S_tp:
        x_tiles = jnp.pad(x_tiles, ((0, 0), (0, 0), (0, 0), (0, S_tp_pad - S_tp)))

    vmem_limit = _vmem_limit_bytes(C_in, C_out, S_tp_pad, T_S, K,
                                   in_bytes, out_bytes, mxu_bytes, cap)

    kernel = functools.partial(_dsconv_kernel, W=W, K=K, T_S=T_S)

    out_flat = pl.pallas_call(
        kernel,
        out_shape=jax.ShapeDtypeStruct((N, C_out, H * W), x.dtype),
        grid_spec=pltpu.PrefetchScalarGridSpec(
            num_scalar_prefetch=0,
            grid=(N, nT),
            in_specs=[
                pl.BlockSpec((K * K, C_in, 1), lambda n, t: (0, 0, 0)),    # dw taps
                pl.BlockSpec((C_in, 1), lambda n, t: (0, 0)),              # dw (BN) bias
                pl.BlockSpec((C_out, C_in), lambda n, t: (0, 0)),          # pw weight
                pl.BlockSpec((C_out, 1), lambda n, t: (0, 0)),             # pw (BN) bias
                pl.BlockSpec((1, 1, C_in, S_tp_pad), lambda n, t: (n, t, 0, 0)),  # x tile
            ],
            out_specs=pl.BlockSpec((1, C_out, T_S), lambda n, t: (n, 0, t)),
        ),
        compiler_params=pltpu.CompilerParams(
            dimension_semantics=("parallel", "parallel"),
            vmem_limit_bytes=vmem_limit,
        ),
    )(w_taps, b_dw[:, None], w_pw.astype(mxu_dtype), b_pw[:, None], x_tiles)

    return out_flat.reshape(N, C_out, H, W)


# ----------------------------------------------------------------------------
# Deterministic parameters + plain-JAX reference (for verification).
# ----------------------------------------------------------------------------
def make_dsconv_params(key, in_channels, out_channels, kernel_size=3):
    ks = jax.random.split(key, 10)
    f32 = jnp.float32
    return dict(
        dw_weight=0.3 * jax.random.normal(ks[0], (in_channels, kernel_size, kernel_size), f32),
        dw_gamma=1.0 + 0.2 * jax.random.normal(ks[1], (in_channels,), f32),
        dw_beta=0.1 * jax.random.normal(ks[2], (in_channels,), f32),
        dw_mean=0.1 * jax.random.normal(ks[3], (in_channels,), f32),
        dw_var=0.5 + jax.random.uniform(ks[4], (in_channels,), f32),
        pw_weight=0.3 * jax.random.normal(ks[5], (out_channels, in_channels), f32),
        pw_gamma=1.0 + 0.2 * jax.random.normal(ks[6], (out_channels,), f32),
        pw_beta=0.1 * jax.random.normal(ks[7], (out_channels,), f32),
        pw_mean=0.1 * jax.random.normal(ks[8], (out_channels,), f32),
        pw_var=0.5 + jax.random.uniform(ks[9], (out_channels,), f32),
    )


def dsconv_reference(x, params, *, eps=1e-5):
    C_in, K = params["dw_weight"].shape[0], params["dw_weight"].shape[-1]
    pad = K // 2
    y = jax.lax.conv_general_dilated(
        x, params["dw_weight"][:, None, :, :],
        window_strides=(1, 1), padding=((pad, pad), (pad, pad)),
        dimension_numbers=("NCHW", "OIHW", "NCHW"),
        feature_group_count=C_in,
        precision=jax.lax.Precision.HIGHEST)
    s = params["dw_gamma"] / jnp.sqrt(params["dw_var"] + eps)
    y = y * s[None, :, None, None] + (params["dw_beta"] - params["dw_mean"] * s)[None, :, None, None]
    y = jnp.clip(y, 0.0, 6.0)
    z = jax.lax.conv_general_dilated(
        y, params["pw_weight"][:, :, None, None],
        window_strides=(1, 1), padding=((0, 0), (0, 0)),
        dimension_numbers=("NCHW", "OIHW", "NCHW"),
        precision=jax.lax.Precision.HIGHEST)
    s2 = params["pw_gamma"] / jnp.sqrt(params["pw_var"] + eps)
    z = z * s2[None, :, None, None] + (params["pw_beta"] - params["pw_mean"] * s2)[None, :, None, None]
    return z


if __name__ == "__main__":
    key = jax.random.PRNGKey(0)
    kx, kp, kx2 = jax.random.split(key, 3)

    N, C_in, H, W = 2, 4, 16, 16
    C_out = 8
    x = jax.random.normal(kx, (N, C_in, H, W), dtype=jnp.float32)
    params = make_dsconv_params(kp, C_in, C_out, kernel_size=3)
    ref = dsconv_reference(x, params)

    # 1) exact-numerics path (f32 MXU operands)
    y32 = jax.block_until_ready(ds_conv(x, params, mxu_dtype=jnp.float32))
    assert y32.shape == (N, C_out, H, W) and y32.dtype == jnp.float32
    err = float(jnp.max(jnp.abs(y32 - ref)))
    assert jnp.allclose(y32, ref, atol=2e-3, rtol=2e-3), f"f32 path max_err={err}"

    # 2) default fast path (bf16 MXU operands, f32 accumulate)
    ybf = jax.block_until_ready(ds_conv(x, params))
    err = float(jnp.max(jnp.abs(ybf - ref)))
    assert jnp.allclose(ybf, ref, atol=5e-2, rtol=5e-2), f"bf16-MXU path max_err={err}"

    # 3) bf16 activations in -> bf16 out (output dtype follows input dtype)
    xb = x.astype(jnp.bfloat16)
    yb = jax.block_until_ready(ds_conv(xb, params))
    assert yb.dtype == jnp.bfloat16 and yb.shape == (N, C_out, H, W)
    ref_b = dsconv_reference(xb.astype(jnp.float32), params)
    err = float(jnp.max(jnp.abs(yb.astype(jnp.float32) - ref_b)))
    assert jnp.allclose(yb.astype(jnp.float32), ref_b, atol=1.5e-1, rtol=1e-1), \
        f"bf16-io path max_err={err}"

    # 4) multi-tile spatial grid (halo-row path), exact numerics
    H2, W2 = 32, 16
    x2 = jax.random.normal(kx2, (N, C_in, H2, W2), dtype=jnp.float32)
    y2 = jax.block_until_ready(
        ds_conv(x2, params, mxu_dtype=jnp.float32, max_rows_per_tile=8))
    ref2 = dsconv_reference(x2, params)
    err = float(jnp.max(jnp.abs(y2 - ref2)))
    assert jnp.allclose(y2, ref2, atol=2e-3, rtol=2e-3), f"tiled path max_err={err}"

    print("KERNEL_OK")
</pallas_src>

<mosaic_0001>
module attributes {stable_mosaic.version = 11 : i64} {
  func.func @_dsconv_kernel(%arg0: i32, %arg1: i32, %arg2: memref<9x4x1xf32, #tpu.memory_space<vmem>>, %arg3: memref<4x1xf32, #tpu.memory_space<vmem>>, %arg4: memref<8x4xf32, #tpu.memory_space<vmem>>, %arg5: memref<8x1xf32, #tpu.memory_space<vmem>>, %arg6: memref<1x1x4x384xf32, #tpu.memory_space<vmem>>, %arg7: memref<1x8x256xf32, #tpu.memory_space<vmem>>) attributes {dimension_semantics = [#tpu.dimension_semantics<parallel>, #tpu.dimension_semantics<parallel>], iteration_bounds = array<i64: 2, 1>, scalar_prefetch = 0 : i64, scratch_operands = 0 : i64, tpu.core_type = #tpu.core_type<tc>, window_params = [{pipeline_mode = #tpu.pipeline_mode<synchronous>, transform_indices = @transform_0, window_bounds = array<i64: 9, 4, 1>}, {pipeline_mode = #tpu.pipeline_mode<synchronous>, transform_indices = @transform_1, window_bounds = array<i64: 4, 1>}, {pipeline_mode = #tpu.pipeline_mode<synchronous>, transform_indices = @transform_2, window_bounds = array<i64: 8, 4>}, {pipeline_mode = #tpu.pipeline_mode<synchronous>, transform_indices = @transform_3, window_bounds = array<i64: 8, 1>}, {transform_indices = @transform_4, window_bounds = array<i64: 1, 1, 4, 384>}, {transform_indices = @transform_5, window_bounds = array<i64: 1, 8, 256>}]} {
    %c0 = arith.constant 0 : index
    %c0_0 = arith.constant 0 : index
    %c0_1 = arith.constant 0 : index
    %c0_2 = arith.constant 0 : index
    %0 = vector.load %arg6[%c0, %c0_0, %c0_1, %c0_2] : memref<1x1x4x384xf32, #tpu.memory_space<vmem>>, vector<1x1x4x384xf32>
    %1 = vector.shape_cast %0 : vector<1x1x4x384xf32> to vector<4x384xf32>
    %2 = tpu.iota {dimensions = array<i32: 1>} : vector<1x384xi32>
    %c16_i32 = arith.constant 16 : i32
    %c0_i32 = arith.constant 0 : i32
    %3 = arith.cmpi eq, %c16_i32, %c0_i32 : i32
    %c1_i32 = arith.constant 1 : i32
    %4 = arith.select %3, %c1_i32, %c16_i32 : i32
    %5 = vector.broadcast %4 : i32 to vector<1x384xi32>
    %6 = arith.remsi %2, %5 : vector<1x384xi32>
    %c0_i32_3 = arith.constant 0 : i32
    %7 = vector.broadcast %c0_i32_3 : i32 to vector<1x384xi32>
    %8 = arith.cmpi ne, %6, %7 : vector<1x384xi32>
    %c0_i32_4 = arith.constant 0 : i32
    %9 = vector.broadcast %c0_i32_4 : i32 to vector<1x384xi32>
    %10 = arith.cmpi slt, %6, %9 : vector<1x384xi32>
    %c0_i32_5 = arith.constant 0 : i32
    %11 = arith.cmpi slt, %4, %c0_i32_5 : i32
    %12 = vector.broadcast %11 : i1 to vector<1x384xi1>
    %13 = vector.broadcast %12 : vector<1x384xi1> to vector<1x384xi1>
    %14 = arith.xori %10, %13 : vector<1x384xi1>
    %15 = arith.andi %14, %8 : vector<1x384xi1>
    %16 = vector.broadcast %4 : i32 to vector<1x384xi32>
    %17 = arith.addi %6, %16 : vector<1x384xi32>
    %18 = arith.select %15, %17, %6 : vector<1x384xi1>, vector<1x384xi32>
    %cst = arith.constant 0.000000e+00 : f32
    %19 = vector.broadcast %cst : f32 to vector<4x384xf32>
    %c1_i32_6 = arith.constant 1 : i32
    %20 = tpu.dynamic_rotate %1 by %c1_i32_6 dim 1 : vector<4x384xf32>, i32 -> vector<4x384xf32>
    %c1_i32_7 = arith.constant 1 : i32
    %21 = vector.broadcast %c1_i32_7 : i32 to vector<1x384xi32>
    %22 = arith.cmpi sge, %18, %21 : vector<1x384xi32>
    %cst_8 = arith.constant 0.000000e+00 : f32
    %23 = vector.shape_cast %22 : vector<1x384xi1> to vector<1x384xi1>
    %24 = vector.broadcast %23 : vector<1x384xi1> to vector<4x384xi1>
    %25 = vector.broadcast %cst_8 : f32 to vector<4x384xf32>
    %26 = arith.select %24, %20, %25 : vector<4x384xi1>, vector<4x384xf32>
    %c16_i32_9 = arith.constant 16 : i32
    %27 = tpu.dynamic_rotate %26 by %c16_i32_9 dim 1 : vector<4x384xf32>, i32 -> vector<4x384xf32>
    %c0_10 = arith.constant 0 : index
    %c0_11 = arith.constant 0 : index
    %c0_12 = arith.constant 0 : index
    %28 = vector.load %arg2[%c0_10, %c0_11, %c0_12] : memref<9x4x1xf32, #tpu.memory_space<vmem>>, vector<1x4x1xf32>
    %29 = vector.shape_cast %28 : vector<1x4x1xf32> to vector<4x1xf32>
    %30 = vector.broadcast %29 : vector<4x1xf32> to vector<4x384xf32>
    %31 = arith.mulf %27, %30 : vector<4x384xf32>
    %32 = arith.addf %19, %31 : vector<4x384xf32>
    %c1 = arith.constant 1 : index
    %c0_13 = arith.constant 0 : index
    %c0_14 = arith.constant 0 : index
    %33 = vector.load %arg2[%c1, %c0_13, %c0_14] : memref<9x4x1xf32, #tpu.memory_space<vmem>>, vector<1x4x1xf32>
    %34 = vector.shape_cast %33 : vector<1x4x1xf32> to vector<4x1xf32>
    %35 = vector.broadcast %34 : vector<4x1xf32> to vector<4x384xf32>
    %36 = arith.mulf %26, %35 : vector<4x384xf32>
    %37 = arith.addf %32, %36 : vector<4x384xf32>
    %c368_i32 = arith.constant 368 : i32
    %38 = tpu.dynamic_rotate %26 by %c368_i32 dim 1 : vector<4x384xf32>, i32 -> vector<4x384xf32>
    %c2 = arith.constant 2 : index
    %c0_15 = arith.constant 0 : index
    %c0_16 = arith.constant 0 : index
    %39 = vector.load %arg2[%c2, %c0_15, %c0_16] : memref<9x4x1xf32, #tpu.memory_space<vmem>>, vector<1x4x1xf32>
    %40 = vector.shape_cast %39 : vector<1x4x1xf32> to vector<4x1xf32>
    %41 = vector.broadcast %40 : vector<4x1xf32> to vector<4x384xf32>
    %42 = arith.mulf %38, %41 : vector<4x384xf32>
    %43 = arith.addf %37, %42 : vector<4x384xf32>
    %c16_i32_17 = arith.constant 16 : i32
    %44 = tpu.dynamic_rotate %1 by %c16_i32_17 dim 1 : vector<4x384xf32>, i32 -> vector<4x384xf32>
    %c3 = arith.constant 3 : index
    %c0_18 = arith.constant 0 : index
    %c0_19 = arith.constant 0 : index
    %45 = vector.load %arg2[%c3, %c0_18, %c0_19] : memref<9x4x1xf32, #tpu.memory_space<vmem>>, vector<1x4x1xf32>
    %46 = vector.shape_cast %45 : vector<1x4x1xf32> to vector<4x1xf32>
    %47 = vector.broadcast %46 : vector<4x1xf32> to vector<4x384xf32>
    %48 = arith.mulf %44, %47 : vector<4x384xf32>
    %49 = arith.addf %43, %48 : vector<4x384xf32>
    %c4 = arith.constant 4 : index
    %c0_20 = arith.constant 0 : index
    %c0_21 = arith.constant 0 : index
    %50 = vector.load %arg2[%c4, %c0_20, %c0_21] : memref<9x4x1xf32, #tpu.memory_space<vmem>>, vector<1x4x1xf32>
    %51 = vector.shape_cast %50 : vector<1x4x1xf32> to vector<4x1xf32>
    %52 = vector.broadcast %51 : vector<4x1xf32> to vector<4x384xf32>
    %53 = arith.mulf %1, %52 : vector<4x384xf32>
    %54 = arith.addf %49, %53 : vector<4x384xf32>
    %c368_i32_22 = arith.constant 368 : i32
    %55 = tpu.dynamic_rotate %1 by %c368_i32_22 dim 1 : vector<4x384xf32>, i32 -> vector<4x384xf32>
    %c5 = arith.constant 5 : index
    %c0_23 = arith.constant 0 : index
    %c0_24 = arith.constant 0 : index
    %56 = vector.load %arg2[%c5, %c0_23, %c0_24] : memref<9x4x1xf32, #tpu.memory_space<vmem>>, vector<1x4x1xf32>
    %57 = vector.shape_cast %56 : vector<1x4x1xf32> to vector<4x1xf32>
    %58 = vector.broadcast %57 : vector<4x1xf32> to vector<4x384xf32>
    %59 = arith.mulf %55, %58 : vector<4x384xf32>
    %60 = arith.addf %54, %59 : vector<4x384xf32>
    %c383_i32 = arith.constant 383 : i32
    %61 = tpu.dynamic_rotate %1 by %c383_i32 dim 1 : vector<4x384xf32>, i32 -> vector<4x384xf32>
    %c15_i32 = arith.constant 15 : i32
    %62 = vector.broadcast %c15_i32 : i32 to vector<1x384xi32>
    %63 = arith.cmpi slt, %18, %62 : vector<1x384xi32>
    %cst_25 = arith.constant 0.000000e+00 : f32
    %64 = vector.shape_cast %63 : vector<1x384xi1> to vector<1x384xi1>
    %65 = vector.broadcast %64 : vector<1x384xi1> to vector<4x384xi1>
    %66 = vector.broadcast %cst_25 : f32 to vector<4x384xf32>
    %67 = arith.select %65, %61, %66 : vector<4x384xi1>, vector<4x384xf32>
    %c16_i32_26 = arith.constant 16 : i32
    %68 = tpu.dynamic_rotate %67 by %c16_i32_26 dim 1 : vector<4x384xf32>, i32 -> vector<4x384xf32>
    %c6 = arith.constant 6 : index
    %c0_27 = arith.constant 0 : index
    %c0_28 = arith.constant 0 : index
    %69 = vector.load %arg2[%c6, %c0_27, %c0_28] : memref<9x4x1xf32, #tpu.memory_space<vmem>>, vector<1x4x1xf32>
    %70 = vector.shape_cast %69 : vector<1x4x1xf32> to vector<4x1xf32>
    %71 = vector.broadcast %70 : vector<4x1xf32> to vector<4x384xf32>
    %72 = arith.mulf %68, %71 : vector<4x384xf32>
    %73 = arith.addf %60, %72 : vector<4x384xf32>
    %c7 = arith.constant 7 : index
    %c0_29 = arith.constant 0 : index
    %c0_30 = arith.constant 0 : index
    %74 = vector.load %arg2[%c7, %c0_29, %c0_30] : memref<9x4x1xf32, #tpu.memory_space<vmem>>, vector<1x4x1xf32>
    %75 = vector.shape_cast %74 : vector<1x4x1xf32> to vector<4x1xf32>
    %76 = vector.broadcast %75 : vector<4x1xf32> to vector<4x384xf32>
    %77 = arith.mulf %67, %76 : vector<4x384xf32>
    %78 = arith.addf %73, %77 : vector<4x384xf32>
    %c368_i32_31 = arith.constant 368 : i32
    %79 = tpu.dynamic_rotate %67 by %c368_i32_31 dim 1 : vector<4x384xf32>, i32 -> vector<4x384xf32>
    %c8 = arith.constant 8 : index
    %c0_32 = arith.constant 0 : index
    %c0_33 = arith.constant 0 : index
    %80 = vector.load %arg2[%c8, %c0_32, %c0_33] : memref<9x4x1xf32, #tpu.memory_space<vmem>>, vector<1x4x1xf32>
    %81 = vector.shape_cast %80 : vector<1x4x1xf32> to vector<4x1xf32>
    %82 = vector.broadcast %81 : vector<4x1xf32> to vector<4x384xf32>
    %83 = arith.mulf %79, %82 : vector<4x384xf32>
    %84 = arith.addf %78, %83 : vector<4x384xf32>
    %c0_34 = arith.constant 0 : index
    %c0_35 = arith.constant 0 : index
    %85 = vector.load %arg3[%c0_34, %c0_35] : memref<4x1xf32, #tpu.memory_space<vmem>>, vector<4x1xf32>
    %86 = vector.broadcast %85 : vector<4x1xf32> to vector<4x384xf32>
    %87 = arith.addf %84, %86 : vector<4x384xf32>
    %cst_36 = arith.constant 0.000000e+00 : f32
    %cst_37 = arith.constant 6.000000e+00 : f32
    %88 = vector.broadcast %cst_36 : f32 to vector<4x384xf32>
    %89 = arith.maximumf %88, %87 : vector<4x384xf32>
    %90 = vector.broadcast %cst_37 : f32 to vector<4x384xf32>
    %91 = arith.minimumf %90, %89 : vector<4x384xf32>
    %92 = vector.extract_strided_slice %91 {offsets = [0, 16], sizes = [4, 256], strides = [1, 1]} : vector<4x384xf32> to vector<4x256xf32>
    %c0_38 = arith.constant 0 : index
    %c0_39 = arith.constant 0 : index
    %93 = vector.load %arg4[%c0_38, %c0_39] : memref<8x4xf32, #tpu.memory_space<vmem>>, vector<8x4xf32>
    %cst_40 = arith.constant dense<0.000000e+00> : vector<8x256xf32>
    %94 = tpu.matmul %93, %92, %cst_40 {dimension_numbers = #tpu.dot_dimension_numbers<[1], [0], [0], [1], [0, 0, 1, 1], [], []>} : vector<8x4xf32>, vector<4x256xf32>, vector<8x256xf32> -> vector<8x256xf32>
    %c0_41 = arith.constant 0 : index
    %c0_42 = arith.constant 0 : index
    %95 = vector.load %arg5[%c0_41, %c0_42] : memref<8x1xf32, #tpu.memory_space<vmem>>, vector<8x1xf32>
    %96 = vector.broadcast %95 : vector<8x1xf32> to vector<8x256xf32>
    %97 = arith.addf %94, %96 : vector<8x256xf32>
    %c0_43 = arith.constant 0 : index
    %c0_44 = arith.constant 0 : index
    %c0_45 = arith.constant 0 : index
    %98 = vector.load %arg7[%c0_43, %c0_44, %c0_45] : memref<1x8x256xf32, #tpu.memory_space<vmem>>, vector<1x8x256xf32>
    %99 = vector.shape_cast %98 : vector<1x8x256xf32> to vector<8x256xf32>
    %100 = vector.shape_cast %97 : vector<8x256xf32> to vector<1x8x256xf32>
    tpu.vector_store %arg7[%c0_43, %c0_44, %c0_45], %100 {strides = array<i32>} : memref<1x8x256xf32, #tpu.memory_space<vmem>>, vector<1x8x256xf32>,
    return
  }
  func.func @transform_0(%arg0: i32, %arg1: i32) -> (i32, i32, i32) {
    %c0_i32 = arith.constant 0 : i32
    %c0_i32_0 = arith.constant 0 : i32
    %c0_i32_1 = arith.constant 0 : i32
    %c0_i32_2 = arith.constant 0 : i32
    return %c0_i32, %c0_i32_0, %c0_i32_1 : i32, i32, i32
  }
  func.func @transform_1(%arg0: i32, %arg1: i32) -> (i32, i32) {
    %c0_i32 = arith.constant 0 : i32
    %c0_i32_0 = arith.constant 0 : i32
    %c0_i32_1 = arith.constant 0 : i32
    return %c0_i32, %c0_i32_0 : i32, i32
  }
  func.func @transform_2(%arg0: i32, %arg1: i32) -> (i32, i32) {
    %c0_i32 = arith.constant 0 : i32
    %c0_i32_0 = arith.constant 0 : i32
    %c0_i32_1 = arith.constant 0 : i32
    return %c0_i32, %c0_i32_0 : i32, i32
  }
  func.func @transform_3(%arg0: i32, %arg1: i32) -> (i32, i32) {
    %c0_i32 = arith.constant 0 : i32
    %c0_i32_0 = arith.constant 0 : i32
    %c0_i32_1 = arith.constant 0 : i32
    return %c0_i32, %c0_i32_0 : i32, i32
  }
  func.func @transform_4(%arg0: i32, %arg1: i32) -> (i32, i32, i32, i32) {
    %c0_i32 = arith.constant 0 : i32
    %c0_i32_0 = arith.constant 0 : i32
    %c0_i32_1 = arith.constant 0 : i32
    return %arg0, %arg1, %c0_i32, %c0_i32_0 : i32, i32, i32, i32
  }
  func.func @transform_5(%arg0: i32, %arg1: i32) -> (i32, i32, i32) {
    %c0_i32 = arith.constant 0 : i32
    %c0_i32_0 = arith.constant 0 : i32
    return %arg0, %c0_i32, %arg1 : i32, i32, i32
  }
}

</mosaic_0001>

<bundles_post_ra>
// kernel: tpu_custom_call.1
= control target key start
LH: loop header
LB: loop body
LE: loop exit
PB: predicated region body
PF: predicated region fallthrough
CT: control target
= control target key end

     0   :  { %10 = vsyncpa [#allocation3], 0  ;;  %s1205_s0 = inlined_call_operand.vmem [shape: f32[9,4,1], index: 0, kind: input, shape index: {}]   ;;  %s1206_s1 = inlined_call_operand.vmem [shape: f32[4,1], index: 1, kind: input, shape index: {}]   ;;  %s1207_s2 = inlined_call_operand.vmem [shape: f32[8,4], index: 2, kind: input, shape index: {}]   ;;  %s1208_s3 = inlined_call_operand.vmem [shape: f32[8,1], index: 3, kind: input, shape index: {}]   ;;  %s1209_s4 = inlined_call_operand.vmem [shape: f32[2,1,4,384], index: 4, kind: input, shape index: {}]   ;;  %s1210_s5 = inlined_call_operand.hbm [shape: f32[2,8,256], index: 5, kind: output, shape index: {}]  }
   0x1   :  { %12 = vsyncpa [#allocation3 + $0x1], 0  ;;  %s951_s18 = smov 0   ;;  %s953_s19 = smov 0  }
   0x2   :  { %s955_s20 = smov 0   ;;  %s957_s21 = smov 0  }
   0x3   :  { %s959_s22 = smov 0   ;;  %s961_s23 = smov 0  }
   0x4 LB: > { %s745_s24 = sadd.s32 4294967295, %s913_s23   ;;  %s746_s25 = sadd.s32 4294967294, %s913_s23   ;;  %s913_s23 = sphi %s961_s23, %s18_s23   ;;  %s909_s22 = sphi %s959_s22, %s1217_s22   ;;  %s905_s21 = sphi %s957_s21, %s1216_s21   ;;  %s901_s20 = sphi %s955_s20, %s1215_s20   ;;  %s897_s19 = sphi %s953_s19, %s1214_s19   ;;  %s893_s18 = sphi %s951_s18, %s1213_s18  }
   0x5   : > { %s30_s26 = sadd.s32 1, %s909_s22  ;;  %s151_s27 = sadd.s32 1, %s901_s20 }
   0x6   : > { %p32_p0 = scmp.ge.s32.totalorder %s30_s26, 2  ;;  %p161_p1 = scmp.ne.s32.totalorder %s901_s20, %s897_s19 }
   0x7   : > { %p162_p2 = scmp.eq.s32.totalorder %s745_s24, 1  ;;  %p167_p3 = scmp.ne.s32.totalorder %s897_s19, %s893_s18 }
   0x8   : > { %s1219_s26 = smov (%p32_p0, %s30_s26), 0  ;;  %p168_p5 = scmp.eq.s32.totalorder %s746_s25, 1 }
   0x9   : > { %p991_p4 = por %p162_p2, %p161_p1  ;;  %s146_s29 = ssub.s32 %s909_s22, %s1219_s26 }
   0xa   : > { %p749_p6 = scmp.ge.s32.totalorder %s913_s23, 1  ;;  %p149_p7 = scmp.eq.s32.totalorder %s146_s29, 0 }
   0xb   : > { %p998_p8 = por %p168_p5, %p167_p3  ;;  %p210_p9 = scmp.lt.s32.totalorder %s913_s23, 3 }
   0xc   : > { %s1004_s6 = scalar_select %p149_p7, %s901_s20, %s151_s27  }
   0xd   : > { %p211_p10 = pnand %p749_p6, %p210_p9 }
   0xe   : > { %p242_p11 = scmp.lt.s32.totalorder (!%p211_p10), %s905_s21, 1  ;;  %s916_s24 = smov (!%p211_p10), 1  }
   0xf   : > { %214 = sbr.rel (%p211_p10) target bundleno = 675 (0x2a3), region = 40  ;;  %s918_s25 = smov (!%p211_p10), 16  }
  0x10   : > { %s919_s27 = smov (!%p211_p10), 112   ;;  %s920_s29 = smov (!%p211_p10), 127  }
  0x11   : > { %s239_s11 = sand.u32 (!%p211_p10), 1, %s897_s19   ;;  %s769_s12 = sshll.u32 (!%p211_p10), %s905_s21, 4 }
  0x12   : > { %s661_s15 = scalar_lea.hbm (!%p211_p10), %s1210_s5, %s769_s12  ;;  %s855_s9 = scalar_lea.hbm (!%p211_p10), %s1210_s5, 32 }
  0x14   : > { %v755_v0 = vld [vmem:[%s1205_s0 + $0x10] sm:$0xf]  ;;  %v337_v1 = vld [vmem:[%s1205_s0] sm:$0xf]  ;;  %v915_v2 = vmov 0   ;;  %s243_s13 = scalar_select %p242_p11, %s905_s21, 1  ;;  %v254_v12 = vlaneseq }
  0x15   : > { %832 = vset.pattern.permute.xlu0 %v915_v2  ;;  %833 = vset.pattern.permute.xlu1 %v915_v2  ;;  %v752_v3 = vld [vmem:[%s1205_s0 + $0x4] sm:$0xf]  ;;  %v917_v9 = vmov 839922192   ;;  %v753_v45 = vld [vmem:[%s1205_s0 + $0x8] sm:$0xf] }
  0x16   : > { %420 = vperm.xlu0 %832, %v755_v0   ;;  %340 = vperm.xlu1 %833, %v337_v1   ;;  %s770_s14 = smul.u32 12, %s243_s13  ;;  %v423_v10 = vunpack.c.l.s4 %v917_v9  ;;  %v1020_v15 = vand.u32 127, %v254_v12  ;;  %v754_v46 = vld [vmem:[%s1205_s0 + $0xc] sm:$0xf]  ;;  %v758_v47 = vld [vmem:[%s1205_s0 + $0x1c] sm:$0xf] }
  0x17   : > { %834 = vset.pattern.permute.xlu2 %v915_v2  ;;  %v756_v48 = vld [vmem:[%s1205_s0 + $0x14] sm:$0xf]  ;;  %v757_v49 = vld [vmem:[%s1205_s0 + $0x18] sm:$0xf]  ;;  %vm593_vm10 = vcmask 916480   ;;  %vm600_vm11 = vcmask 1043456  }
  0x18   : > { %353 = vperm.xlu2 %834, %v752_v3   ;;  %s250_s17 = scalar_lea.vmem %s1209_s4, %s770_s14  ;;  %v424_v11 = vunpack.c.0.s8 %v423_v10  ;;  %v1025_v22 = vadd.s32 128, %v1020_v15  ;;  %vm311_vm0 = vcmp.lt.s32.totalorder %v1020_v15, 1  ;;  %v1030_v24 = vadd.s32 256, %v1020_v15 }
  0x19   : > { %v252_v4 = vld [vmem:[%s250_s17] sm:$0xff]  ;;  %v253_v5 = vld [vmem:[%s250_s17 + $0x8] sm:$0xf]  ;;  %v262_v33 = vand.u32 15, %v1020_v15  ;;  %vm489_vm4 = vcmp.lt.s32.totalorder %v1020_v15, 127  ;;  %vm333_vm6 = vcmp.lt.s32.totalorder %v1020_v15, 16 }
  0x1a   : > { %296 = vst [vmem:[#allocation1] ss:$2 sm:$0xff] %v252_v4  ;;  %v269_v23 = vand.u32 15, %v1025_v22  ;;  %v276_v31 = vand.u32 15, %v1030_v24  ;;  %vm368_vm7 = vcmp.lt.s32.totalorder %v1020_v15, 112  ;;  %vm596_vm12 = vcmask 31744  }
  0x1b   : > { %298 = vst [vmem:[#allocation1 + $0x10] ss:$2 sm:$0xff] %v253_v5  ;;  %vm315_vm3 = vcmp.ge.s32.totalorder %v262_v33, 1  ;;  %vm493_vm5 = vcmp.lt.s32.totalorder %v262_v33, 15 }
  0x1c   : > { %vm316_vm1 = vcmp.ge.s32.totalorder %v269_v23, 1  ;;  %vm317_vm2 = vcmp.ge.s32.totalorder %v276_v31, 1  ;;  %vm495_vm8 = vcmp.lt.s32.totalorder %v276_v31, 15  ;;  %vm494_vm9 = vcmp.lt.s32.totalorder %v269_v23, 15 }
  0x21   : > { %v300_v6 = vld.sshfl [vmem:[#allocation1 + $0x8] sm:$0xff pattern:$0x75316420]  ;;  %v299_v7 = vld.sshfl [vmem:[#allocation1] sm:$0xff pattern:$0x75316420] }
  0x22   : > { %307 = vrot.lane.b32.xlu1 %v300_v6, %s916_s24  ;;  %305 = vrot.lane.b32.xlu0 %v299_v7, %s916_s24  ;;  %385 = vst [vmem:[#allocation1] ss:$2 sm:$0xff] %v252_v4  ;;  %v301_v8 = vld.sshfl [vmem:[#allocation1 + $0x10] sm:$0xff pattern:$0x75316420] }
  0x23   : > { %387 = vst [vmem:[#allocation1 + $0x10] ss:$2 sm:$0xff] %v253_v5 }
  0x29   : > { %v388_v16 = vld.sshfl [vmem:[#allocation1] sm:$0xff pattern:$0x75316420]  ;;  %v389_v17 = vld.sshfl [vmem:[#allocation1 + $0x8] sm:$0xff pattern:$0x75316420] }
  0x2a   : > { %309 = vrot.lane.b32.xlu1 %v301_v8, %s916_s24  ;;  %v390_v18 = vld.sshfl [vmem:[#allocation1 + $0x10] sm:$0xff pattern:$0x75316420]  ;;  %s665_s24 = sshll.u32 %s661_s15, 4  ;;  %s666_s24 = int_to_ptr.hbm [resolvable:$true] %s665_s24 }
  0x72   : > { %v354_v50 = vpop.permute.xlu2 %353 }
  0x88   : > { %v421_v13 = vpop.permute.xlu0 %420  ;;  %v1022_v21 = vpop.permute.xlu1 %340 }
  0x89   : > { %v425_v14 = vperm.slane %v421_v13, %v424_v11 }
  0x8b   : > { %v427_v19 = vmul.f32 %v425_v14, %v252_v4  ;;  %v428_v20 = vmul.f32 %v425_v14, %v253_v5 }
  0x8d   : > { %431 = vst [vmem:[#allocation1] ss:$2 sm:$0xff] %v427_v19  ;;  %v562_v19 = vld [vmem:[%s1206_s1] sm:$0xf] }
  0x8e   : > { %433 = vst [vmem:[#allocation1 + $0x10] ss:$2 sm:$0xff] %v428_v20 }
  0x94   : > { %v1032_v25 = vld.sshfl [vmem:[#allocation1] sm:$0xff pattern:$0x75316420]  ;;  %v1034_v26 = vld.sshfl [vmem:[#allocation1 + $0x8] sm:$0xff pattern:$0x75316420]  ;;  %v308_v28 = vpop.permute.xlu1 %307  ;;  %v306_v29 = vpop.permute.xlu0 %305 }
  0x95   : > { %v1036_v27 = vld.sshfl [vmem:[#allocation1 + $0x10] sm:$0xff pattern:$0x75316420]  ;;  %443 = vst [vmem:[#allocation1] ss:$2 sm:$0xff] %v252_v4  ;;  %v313_v30 = vsel %vm311_vm0, %v306_v29, %v308_v28 }
  0x96   : > { %445 = vst [vmem:[#allocation1 + $0x10] ss:$2 sm:$0xff] %v253_v5  ;;  %v325_v32 = vsel %vm316_vm1, %v313_v30, 0.0 }
  0x97   : > { %329 = vrot.lane.b32.xlu2 %v325_v32, %s918_s25  ;;  %v357_v57 = vmul.f32 %v354_v50, %v325_v32 }
  0x9c   : > { %v446_v34 = vld.sshfl [vmem:[#allocation1] sm:$0xff pattern:$0x75316420]  ;;  %v447_v35 = vld.sshfl [vmem:[#allocation1 + $0x8] sm:$0xff pattern:$0x75316420]  ;;  %v310_v37 = vpop.permute.xlu1 %309 }
  0x9d   : > { %v448_v36 = vld.sshfl [vmem:[#allocation1 + $0x10] sm:$0xff pattern:$0x75316420]  ;;  %474 = vst [vmem:[#allocation1] ss:$2 sm:$0xff] %v252_v4  ;;  %v312_v38 = vsel %vm311_vm0, %v308_v28, %v310_v37  ;;  %v314_v39 = vsel %vm311_vm0, %v310_v37, %v306_v29 }
  0x9e   : > { %476 = vst [vmem:[#allocation1 + $0x10] ss:$2 sm:$0xff] %v253_v5  ;;  %v326_v40 = vsel %vm317_vm2, %v312_v38, 0.0  ;;  %v324_v41 = vsel %vm315_vm3, %v314_v39, 0.0  ;;  %v759_v29 = vld [vmem:[%s1205_s0 + $0x20] sm:$0xf] }
  0x9f   : > { %331 = vrot.lane.b32.xlu0 %v326_v40, %s918_s25  ;;  %327 = vrot.lane.b32.xlu1 %v324_v41, %s918_s25  ;;  %v358_v60 = vmul.f32 %v354_v50, %v326_v40  ;;  %v356_v0 = vmul.f32 %v354_v50, %v324_v41 }
  0xa0   : > { %366 = vrot.lane.b32.xlu2 %v326_v40, %s919_s27 }
  0xa4   : > { %v477_v42 = vld.sshfl [vmem:[#allocation1] sm:$0xff pattern:$0x75316420]  ;;  %v478_v44 = vld.sshfl [vmem:[#allocation1 + $0x8] sm:$0xff pattern:$0x75316420] }
  0xa5   : > { %v479_v43 = vld.sshfl [vmem:[#allocation1 + $0x10] sm:$0xff pattern:$0x75316420] }
  0xa7   : > { %362 = vrot.lane.b32.xlu0 %v324_v41, %s919_s27  ;;  %364 = vrot.lane.b32.xlu1 %v325_v32, %s919_s27 }
  0xa8   : > { %483 = vrot.lane.b32.xlu2 %v477_v42, %s920_s29 }
  0xaf   : > { %487 = vrot.lane.b32.xlu0 %v479_v43, %s920_s29  ;;  %394 = vrot.lane.b32.xlu1 %v388_v16, %s918_s25 }
  0xb0   : > { %485 = vrot.lane.b32.xlu2 %v478_v44, %s920_s29  ;;  %s849_s29 = sshra.s32 %s666_s24, 4  ;;  %s850_s29 = int_to_ptr.hbm [resolvable:$true] %s849_s29 }
  0xb1   : > { %s851_s21 = scalar_lea.hbm %s850_s29, 16  ;;  %p856_p1 = scmp.lt.s32.totalorder %s850_s29, %s1210_s5 }
  0xb2   : > { %p852_p12 = scmp.ne.s32.totalorder %s850_s29, %s851_s21  ;;  %p857_p2 = scmp.lt.s32.totalorder %s855_s9, %s851_s21 }
  0xb4   : > { %p853_p13 = pnand %p852_p12, %p991_p4  ;;  %p858_p3 = por %p857_p2, %p856_p1 }
  0xb6   : > { %p854_p0 = pneg %p853_p13 }
  0xb7   : > { %376 = vperm.xlu0 %832, %v753_v45   ;;  %407 = vperm.xlu1 %833, %v754_v46  }
  0xb8   : > { %396 = vrot.lane.b32.xlu2 %v389_v17, %s918_s25  ;;  %p859_p5 = pnand %p858_p3, %p854_p0 }
  0xbf   : > { %398 = vrot.lane.b32.xlu0 %v390_v18, %s918_s25  ;;  %456 = vrot.lane.b32.xlu1 %v448_v36, %s919_s27 }
  0xc0   : > { %452 = vrot.lane.b32.xlu2 %v446_v34, %s919_s27 }
  0xc7   : > { %531 = vperm.xlu1 %833, %v758_v47   ;;  %454 = vrot.lane.b32.xlu0 %v447_v35, %s919_s27 }
  0xc8   : > { %465 = vperm.xlu2 %834, %v756_v48  }
  0xcf   : > { %518 = vperm.xlu0 %832, %v757_v49  }
  0xf1   : > { %v330_v51 = vpop.permute.xlu2 %329 }
  0xfa   : > { %v367_v52 = vpop.permute.xlu2 %366 }
 0x102   : > { %v484_v53 = vpop.permute.xlu2 %483 }
 0x10a   : > { %v486_v54 = vpop.permute.xlu2 %485 }
 0x10b   : > { %v491_v55 = vsel %vm489_vm4, %v484_v53, %v486_v54 }
 0x10c   : > { %v1080_v56 = vsel %vm493_vm5, %v491_v55, 0.0 }
 0x10d   : > { %505 = vrot.lane.b32.xlu0 %v1080_v56, %s918_s25 }
 0x111   : > { %v328_v58 = vpop.permute.xlu1 %327  ;;  %v332_v59 = vpop.permute.xlu0 %331 }
 0x112   : > { %v335_v61 = vsel %vm333_vm6, %v328_v58, %v330_v51  ;;  %v334_v62 = vsel %vm333_vm6, %v330_v51, %v332_v59  ;;  %v336_v63 = vsel %vm333_vm6, %v332_v59, %v328_v58  ;;  %v397_v30 = vpop.permute.xlu2 %396 }
 0x113   : > { %v344_v1 = vmul.f32 %v1022_v21, %v335_v61  ;;  %v343_v2 = vmul.f32 %v1022_v21, %v336_v63  ;;  %v345_v3 = vmul.f32 %v1022_v21, %v334_v62 }
 0x115   : > { %v360_v4 = vadd.f32 %v357_v57, %v344_v1  ;;  %v359_v5 = vadd.f32 %v356_v0, %v343_v2  ;;  %v361_v6 = vadd.f32 %v358_v60, %v345_v3 }
 0x119   : > { %v363_v7 = vpop.permute.xlu0 %362  ;;  %v365_v14 = vpop.permute.xlu1 %364 }
 0x11a   : > { %v371_v8 = vsel %vm368_vm7, %v367_v52, %v363_v7  ;;  %v369_v16 = vsel %vm368_vm7, %v365_v14, %v367_v52  ;;  %v370_v17 = vsel %vm368_vm7, %v363_v7, %v365_v14  ;;  %v453_v33 = vpop.permute.xlu2 %452 }
 0x121   : > { %v488_v9 = vpop.permute.xlu0 %487  ;;  %v395_v31 = vpop.permute.xlu1 %394 }
 0x122   : > { %v490_v10 = vsel %vm489_vm4, %v486_v54, %v488_v9  ;;  %v492_v11 = vsel %vm489_vm4, %v488_v9, %v484_v53  ;;  %v466_v37 = vpop.permute.xlu2 %465  ;;  %v401_v57 = vsel %vm333_vm6, %v395_v31, %v397_v30 }
 0x123   : > { %v1105_v12 = vsel %vm495_vm8, %v492_v11, 0.0  ;;  %v1107_v13 = vsel %vm494_vm9, %v490_v10, 0.0 }
 0x124   : > { %509 = vrot.lane.b32.xlu2 %v1105_v12, %s918_s25  ;;  %542 = vrot.lane.b32.xlu0 %v1107_v13, %s919_s27 }
 0x125   : > { %507 = vrot.lane.b32.xlu1 %v1107_v13, %s918_s25  ;;  %s648_s25 = scalar_lea.sflag [#allocation3], %s239_s11 }
 0x129   : > { %v377_v18 = vpop.permute.xlu0 %376  ;;  %v408_v34 = vpop.permute.xlu1 %407 }
 0x12a   : > { %v379_v20 = vmul.f32 %v377_v18, %v370_v17  ;;  %v380_v21 = vmul.f32 %v377_v18, %v369_v16  ;;  %v381_v22 = vmul.f32 %v377_v18, %v371_v8  ;;  %v411_v59 = vmul.f32 %v408_v34, %v401_v57 }
 0x12c   : > { %v382_v23 = vadd.f32 %v379_v20, %v359_v5  ;;  %v383_v24 = vadd.f32 %v380_v21, %v360_v4  ;;  %v384_v28 = vadd.f32 %v381_v22, %v361_v6  ;;  %540 = vrot.lane.b32.xlu2 %v1080_v56, %s919_s27  ;;  %565 = vperm.xlu0 %832, %v562_v19  }
 0x12d   : > { %544 = vrot.lane.b32.xlu1 %v1105_v12, %s919_s27 }
 0x12e   : > { %v414_v61 = vadd.f32 %v411_v59, %v383_v24 }
 0x130   : > { %v441_v2 = vadd.f32 %v1034_v26, %v414_v61 }
 0x131   : > { %v399_v32 = vpop.permute.xlu0 %398  ;;  %v457_v38 = vpop.permute.xlu1 %456 }
 0x132   : > { %v402_v36 = vsel %vm333_vm6, %v399_v32, %v395_v31  ;;  %v400_v54 = vsel %vm333_vm6, %v397_v30, %v399_v32  ;;  %v460_v62 = vsel %vm368_vm7, %v457_v38, %v453_v33 }
 0x133   : > { %v410_v39 = vmul.f32 %v408_v34, %v402_v36  ;;  %v412_v55 = vmul.f32 %v408_v34, %v400_v54  ;;  %v470_v0 = vmul.f32 %v466_v37, %v460_v62 }
 0x134   : > { %553 = vperm.xlu2 %834, %v759_v29  }
 0x135   : > { %v413_v42 = vadd.f32 %v410_v39, %v382_v23  ;;  %v578_v39 = vld [vmem:[%s1208_s3] sm:$0xff] }
 0x137   : > { %v440_v45 = vadd.f32 %v1032_v25, %v413_v42  ;;  %v415_v25 = vadd.f32 %v412_v55, %v384_v28 }
 0x139   : > { %v455_v35 = vpop.permute.xlu0 %454  ;;  %v532_v47 = vpop.permute.xlu1 %531 }
 0x13a   : > { %v459_v41 = vsel %vm368_vm7, %v453_v33, %v455_v35  ;;  %v534_v51 = vmul.f32 %v532_v47, %v1080_v56  ;;  %v458_v60 = vsel %vm368_vm7, %v455_v35, %v457_v38  ;;  %v442_v56 = vadd.f32 %v1036_v27, %v415_v25 }
 0x13b   : > { %v468_v43 = vmul.f32 %v466_v37, %v459_v41  ;;  %v469_v63 = vmul.f32 %v466_v37, %v458_v60  ;;  %v535_v14 = vmul.f32 %v532_v47, %v1107_v13  ;;  %v536_v26 = vmul.f32 %v532_v47, %v1105_v12  ;;  %v577_v41 = vld [vmem:[%s1207_s2] sm:$0xff] }
 0x13c   : > { %v473_v5 = vadd.f32 %v470_v0, %v442_v56 }
 0x13d   : > { %v471_v49 = vadd.f32 %v468_v43, %v440_v45  ;;  %v472_v9 = vadd.f32 %v469_v63, %v441_v2 }
 0x141   : > { %v519_v40 = vpop.permute.xlu0 %518 }
 0x17e   : > { %v510_v44 = vpop.permute.xlu2 %509 }
 0x17f   : > { %v506_v46 = vpop.permute.xlu0 %505 }
 0x180   : > { %v513_v48 = vsel %vm333_vm6, %v510_v44, %v506_v46 }
 0x181   : > { %v521_v50 = vmul.f32 %v519_v40, %v513_v48 }
 0x183   : > { %v524_v52 = vadd.f32 %v521_v50, %v471_v49 }
 0x185   : > { %v537_v53 = vadd.f32 %v534_v51, %v524_v52 }
 0x186   : > { %v541_v58 = vpop.permute.xlu2 %540 }
 0x18e   : > { %v554_v6 = vpop.permute.xlu2 %553 }
 0x196   : > { %v543_v1 = vpop.permute.xlu0 %542 }
 0x197   : > { %v547_v3 = vsel %vm368_vm7, %v541_v58, %v543_v1  ;;  %v508_v4 = vpop.permute.xlu1 %507 }
 0x198   : > { %v511_v7 = vsel %vm333_vm6, %v508_v4, %v510_v44  ;;  %v512_v8 = vsel %vm333_vm6, %v506_v46, %v508_v4  ;;  %v556_v10 = vmul.f32 %v554_v6, %v547_v3 }
 0x199   : > { %v522_v27 = vmul.f32 %v519_v40, %v512_v8  ;;  %v523_v11 = vmul.f32 %v519_v40, %v511_v7 }
 0x19a   : > { %v559_v18 = vadd.f32 %v556_v10, %v537_v53 }
 0x19b   : > { %v525_v16 = vadd.f32 %v522_v27, %v472_v9  ;;  %v526_v17 = vadd.f32 %v523_v11, %v473_v5 }
 0x19d   : > { %v538_v19 = vadd.f32 %v535_v14, %v525_v16  ;;  %v539_v20 = vadd.f32 %v536_v26, %v526_v17 }
 0x19e   : > { %v566_v21 = vpop.permute.xlu0 %565 }
 0x19f   : > { %v568_v22 = vadd.f32 %v566_v21, %v559_v18  ;;  %v545_v23 = vpop.permute.xlu1 %544 }
 0x1a0   : > { %v546_v24 = vsel %vm368_vm7, %v543_v1, %v545_v23  ;;  %v548_v28 = vsel %vm368_vm7, %v545_v23, %v541_v58 }
 0x1a1   : > { %v571_v29 = vmax.f32 %v568_v22, 0.0  ;;  %v557_v30 = vmul.f32 %v554_v6, %v546_v24  ;;  %v558_v31 = vmul.f32 %v554_v6, %v548_v28 }
 0x1a3   : > { %v560_v13 = vadd.f32 %v557_v30, %v538_v19  ;;  %v561_v32 = vadd.f32 %v558_v31, %v539_v20  ;;  %v574_v12 = vmin.f32 %v571_v29, 6.0 }
 0x1a5   : > { %587 = vrot.lane.b32.xlu1 %v574_v12, %s919_s27  ;;  %v570_v33 = vadd.f32 %v566_v21, %v561_v32  ;;  %v569_v34 = vadd.f32 %v566_v21, %v560_v13 }
 0x1a7   : > { %v573_v35 = vmax.f32 %v570_v33, 0.0  ;;  %v572_v36 = vmax.f32 %v569_v34, 0.0 }
 0x1a9   : > { %v576_v37 = vmin.f32 %v573_v35, 6.0  ;;  %v575_v38 = vmin.f32 %v572_v36, 6.0 }
 0x1ab   : > { %591 = vrot.lane.b32.xlu0 %v576_v37, %s919_s27  ;;  %589 = vrot.lane.b32.xlu2 %v575_v38, %s919_s27  ;;  %s750_s27 = sshll.u32 %s239_s11, 4 }
 0x1ac   : > { %s241_s16 = scalar_lea.vmem [#allocation2], %s750_s27 }
 0x1ad   : > { %581 = vperm.xlu1 %833, %v578_v39   ;;  %s663_s17 = sshll.u32 %s241_s16, 4  ;;  %s664_s17 = int_to_ptr.vmem [resolvable:$true] %s663_s17 }
 0x205   : > { %v590_v15 = vpop.permute.xlu2 %589 }
 0x217   : > { %v588_v40 = vpop.permute.xlu1 %587 }
 0x218   : > { %v594_v42 = vsel %vm593_vm10, %v588_v40, %v590_v15 }
 0x219   : > { %760 = vmatpush.msk.msra.mxu0 %vm600_vm11, %v594_v42 }
 0x21a   : > { %761 = vmatmul.msk.f32.vlgmr.msra.gmra.mxu0 %vm596_vm12, %v577_v41 }
 0x21d   : > { %v592_v43 = vpop.permute.xlu0 %591 }
 0x21e   : > { %v595_v44 = vsel %vm593_vm10, %v590_v15, %v592_v43 }
 0x21f   : > { %762 = vmatpush.msk.msra.mxu1 %vm600_vm11, %v595_v44  ;;  %v582_v45 = vpop.permute.xlu1 %581 }
 0x220   : > { %763 = vmatmul.msk.f32.vlgmr.msra.gmra.mxu1 %vm596_vm12, %v577_v41 }
 0x297   : > { %v622_v46 = vpop.f32.mrf.mxu0 }
 0x298   : > { %v623_v47 = vadd.f32 %v622_v46, %v582_v45 }
 0x29a   : > { %645 = vst [vmem:[%s241_s16] sm:$0xff] %v623_v47 }
 0x29d   : > { %v642_v48 = vpop.f32.mrf.mxu1 }
 0x29e   : > { %v643_v49 = vadd.f32 %v642_v48, %v582_v45 }
 0x2a0   : > { %646 = vst [vmem:[%s241_s16 + $0x8] sm:$0xff] %v643_v49 }
 0x2a1   : > { %862 = shalt.err (!%p859_p5)
}
 0x2a2   : > { %771 = dma.vmem_to_hbm [thread:$0]  (%p991_p4), %s664_s17, 256, %s666_s24, %s648_s25  }
 0x2a3 PF: > { %p777_p6 = scmp.ge.s32.totalorder %s913_s23, 2  ;;  %s677_s11 = sand.u32 1, %s893_s18  }
 0x2a4   : > { %s678_s12 = scalar_lea.sflag [#allocation3], %s677_s11 }
 0x2a5   : > { %p774_p7 = pnand %p777_p6, %p998_p8 }
 0x2a7   : > { %p775_p9 = pneg %p774_p7 }
 0x2a9   : > { %888 = dma.done.wait (%p775_p9), %s678_s12, 256  }
 0x2aa   : > { %890 = vsyncadd (%p775_p9), %s678_s12, 4294967040  ;;  %s18_s23 = sadd.s32 1, %s913_s23   ;;  %s1213_s18 = smov %s897_s19 }
 0x2ab   : > { %p15_p10 = scmp.ge.s32.totalorder %s18_s23, 4   ;;  %s1214_s19 = smov %s901_s20 }
 0x2ac   : > { %s1215_s20 = smov %s1004_s6  ;;  %s1216_s21 = smov %s909_s22 }
 0x2ad   : > { %s1217_s22 = smov %s1219_s26  ;;  %17 = sbr.rel (!%p15_p10) target bundleno = 4 (0x4), region = 88 }
 0x2b2   :  { %684 = vsyncpa [#allocation3], 1 }
 0x2b3   :  { %686 = vsyncpa [#allocation3 + $0x1], 1 }

</bundles_post_ra>
